<compile_context>
chip_gen: v7x
topology: tpu7x:2x2x1
jax: 0.10.0
libtpu: 0.0.40
codegen_flags: <defaults>
</compile_context>

<pallas_src>
import jax
import jax.numpy as jnp
from jax.experimental import pallas as pl
from jax.experimental.pallas import tpu as pltpu

LANE = 128
NUM_CORES = 2          # leading "parallel" grid axis (v7x megacore split)
MAX_BLOCK_ROWS = 1024  # 1024x128 f32 = 512 KiB per input tile


def _cdiv(a, b):
    return -(-a // b)


def _fold_to_sublane(acc_ref):
    """Reduce a (rows, LANE) accumulator to (1, 8, LANE) via sublane-group adds."""
    rows, lanes = acc_ref.shape
    return acc_ref[...].reshape(1, rows // 8, 8, lanes).sum(axis=1)


def _dice_bce_kernel(x_ref, t_ref,
                     inter_out, pt_out, bce_out,
                     inter_acc, pt_acc, bce_acc):
    i = pl.program_id(1)

    @pl.when(i == 0)
    def _init():
        inter_acc[...] = jnp.zeros_like(inter_acc)
        pt_acc[...] = jnp.zeros_like(pt_acc)
        bce_acc[...] = jnp.zeros_like(bce_acc)

    x = x_ref[...].astype(jnp.float32)
    t = t_ref[...].astype(jnp.float32)

    # Numerically stable sigmoid + logits-form BCE sharing exp(-|x|).
    e = jnp.exp(-jnp.abs(x))
    denom = 1.0 + e
    p = jnp.where(x >= 0, 1.0, e) / denom              # sigmoid(x)
    bce = jnp.maximum(x, 0.0) - x * t + jnp.log1p(e)   # per-element BCE

    # Pure VPU elementwise accumulation; padded elements contribute zero.
    inter_acc[...] += p * t
    pt_acc[...] += p + t
    bce_acc[...] += bce

    @pl.when(i == pl.num_programs(1) - 1)
    def _finalize():
        inter_out[...] = _fold_to_sublane(inter_acc)
        pt_out[...] = _fold_to_sublane(pt_acc)
        bce_out[...] = _fold_to_sublane(bce_acc)


def dice_bce_loss(inputs, targets, smooth=1.0,
                  max_block_rows=MAX_BLOCK_ROWS, num_cores=NUM_CORES):
    """DiceBCELoss(inputs_logits, targets) -> scalar, matching the PyTorch module."""
    x = inputs.reshape(-1)
    t = targets.reshape(-1)
    n = x.shape[0]

    rows_needed = _cdiv(n, LANE)
    block_rows = min(max_block_rows, _cdiv(rows_needed, num_cores))
    block_rows = max(8, ((block_rows + 7) // 8) * 8)
    rows_per_core = _cdiv(rows_needed, num_cores * block_rows) * block_rows
    steps = rows_per_core // block_rows
    total_rows = rows_per_core * num_cores

    pad = total_rows * LANE - n
    if pad:
        # Padded logits -> sigmoid==0, BCE==0; padded targets==0 -> all sums
        # unaffected, so no in-kernel mask is required.
        x = jnp.pad(x, (0, pad), constant_values=-1e4)
        t = jnp.pad(t, (0, pad), constant_values=0)

    x = x.reshape(total_rows, LANE)
    t = t.reshape(total_rows, LANE)

    in_spec = pl.BlockSpec((block_rows, LANE), lambda c, i: (c * steps + i, 0))
    out_spec = pl.BlockSpec((1, 8, LANE), lambda c, i: (c, 0, 0))
    part_shape = jax.ShapeDtypeStruct((num_cores, 8, LANE), jnp.float32)

    inter_p, pt_p, bce_p = pl.pallas_call(
        _dice_bce_kernel,
        out_shape=(part_shape, part_shape, part_shape),
        grid_spec=pltpu.PrefetchScalarGridSpec(
            num_scalar_prefetch=0,
            grid=(num_cores, steps),
            in_specs=[in_spec, in_spec],
            out_specs=[out_spec, out_spec, out_spec],
            scratch_shapes=[
                pltpu.VMEM((block_rows, LANE), jnp.float32),
                pltpu.VMEM((block_rows, LANE), jnp.float32),
                pltpu.VMEM((block_rows, LANE), jnp.float32),
            ],
        ),
        compiler_params=pltpu.CompilerParams(
            dimension_semantics=("parallel", "arbitrary"),
        ),
    )(x, t)

    # Tiny scalar epilogue: combine the per-core / per-lane partial sums.
    intersection = jnp.sum(inter_p)
    pt_sum = jnp.sum(pt_p)
    bce_sum = jnp.sum(bce_p)

    dice_loss = 1.0 - (2.0 * intersection + smooth) / (pt_sum + smooth)
    bce_mean = bce_sum / jnp.float32(n)
    return bce_mean + dice_loss


def _reference_loss(inputs, targets, smooth=1.0):
    p = jax.nn.sigmoid(inputs.reshape(-1).astype(jnp.float32))
    t = targets.reshape(-1).astype(jnp.float32)
    inter = jnp.sum(p * t)
    dice = 1.0 - (2.0 * inter + smooth) / (jnp.sum(p) + jnp.sum(t) + smooth)
    bce = jnp.mean(-(t * jnp.log(p) + (1.0 - t) * jnp.log1p(-p)))
    return bce + dice


if __name__ == "__main__":
    key = jax.random.PRNGKey(0)
    k1, k2, k3, k4 = jax.random.split(key, 4)

    # NCHW logits and binary targets (divisible case, exercises no-pad path).
    B, C, H, W = 2, 4, 16, 16
    inputs = jax.random.normal(k1, (B, C, H, W), dtype=jnp.float32)
    targets = jax.random.bernoulli(k2, 0.5, (B, C, H, W)).astype(jnp.float32)

    loss = jax.block_until_ready(dice_bce_loss(inputs, targets, smooth=1.0))
    ref = jax.block_until_ready(_reference_loss(inputs, targets, smooth=1.0))
    assert jnp.abs(loss - ref) < 1e-4, (loss, ref)

    # Ragged size (not a multiple of 128) to exercise the padding path.
    inputs2 = jax.random.normal(k3, (3, 5, 7, 11), dtype=jnp.float32)
    targets2 = jax.random.bernoulli(k4, 0.5, (3, 5, 7, 11)).astype(jnp.float32)
    loss2 = jax.block_until_ready(dice_bce_loss(inputs2, targets2, smooth=1.0))
    ref2 = jax.block_until_ready(_reference_loss(inputs2, targets2, smooth=1.0))
    assert jnp.abs(loss2 - ref2) < 1e-4, (loss2, ref2)

    print("KERNEL_OK")
</pallas_src>

<mosaic_0001>
module attributes {stable_mosaic.version = 11 : i64} {
  func.func @_dice_bce_kernel(%arg0: i32, %arg1: i32, %arg2: memref<8x128xf32, #tpu.memory_space<vmem>>, %arg3: memref<8x128xf32, #tpu.memory_space<vmem>>, %arg4: memref<1x8x128xf32, #tpu.memory_space<vmem>>, %arg5: memref<1x8x128xf32, #tpu.memory_space<vmem>>, %arg6: memref<1x8x128xf32, #tpu.memory_space<vmem>>, %arg7: memref<8x128xf32, #tpu.memory_space<vmem>>, %arg8: memref<8x128xf32, #tpu.memory_space<vmem>>, %arg9: memref<8x128xf32, #tpu.memory_space<vmem>>) attributes {dimension_semantics = [#tpu.dimension_semantics<parallel>, #tpu.dimension_semantics<arbitrary>], iteration_bounds = array<i64: 2, 1>, scalar_prefetch = 0 : i64, scratch_operands = 3 : i64, tpu.core_type = #tpu.core_type<tc>, window_params = [{transform_indices = @transform_0, window_bounds = array<i64: 8, 128>}, {transform_indices = @transform_1, window_bounds = array<i64: 8, 128>}, {transform_indices = @transform_2, window_bounds = array<i64: 1, 8, 128>}, {transform_indices = @transform_3, window_bounds = array<i64: 1, 8, 128>}, {transform_indices = @transform_4, window_bounds = array<i64: 1, 8, 128>}]} {
    %c0_i32 = arith.constant 0 : i32
    %0 = arith.cmpi eq, %arg1, %c0_i32 : i32
    %1 = arith.extui %0 : i1 to i32
    %c0_i32_0 = arith.constant 0 : i32
    %2 = arith.cmpi ne, %1, %c0_i32_0 : i32
    scf.if %2 {
      %cst_22 = arith.constant 0.000000e+00 : f32
      %36 = vector.broadcast %cst_22 : f32 to vector<8x128xf32>
      %c0_23 = arith.constant 0 : index
      %c0_24 = arith.constant 0 : index
      %37 = vector.load %arg7[%c0_23, %c0_24] : memref<8x128xf32, #tpu.memory_space<vmem>>, vector<8x128xf32>
      tpu.vector_store %arg7[%c0_23, %c0_24], %36 {strides = array<i32>} : memref<8x128xf32, #tpu.memory_space<vmem>>, vector<8x128xf32>,
      %cst_25 = arith.constant 0.000000e+00 : f32
      %38 = vector.broadcast %cst_25 : f32 to vector<8x128xf32>
      %c0_26 = arith.constant 0 : index
      %c0_27 = arith.constant 0 : index
      %39 = vector.load %arg8[%c0_26, %c0_27] : memref<8x128xf32, #tpu.memory_space<vmem>>, vector<8x128xf32>
      tpu.vector_store %arg8[%c0_26, %c0_27], %38 {strides = array<i32>} : memref<8x128xf32, #tpu.memory_space<vmem>>, vector<8x128xf32>,
      %cst_28 = arith.constant 0.000000e+00 : f32
      %40 = vector.broadcast %cst_28 : f32 to vector<8x128xf32>
      %c0_29 = arith.constant 0 : index
      %c0_30 = arith.constant 0 : index
      %41 = vector.load %arg9[%c0_29, %c0_30] : memref<8x128xf32, #tpu.memory_space<vmem>>, vector<8x128xf32>
      tpu.vector_store %arg9[%c0_29, %c0_30], %40 {strides = array<i32>} : memref<8x128xf32, #tpu.memory_space<vmem>>, vector<8x128xf32>,
    } else {
    }
    %c0 = arith.constant 0 : index
    %c0_1 = arith.constant 0 : index
    %3 = vector.load %arg2[%c0, %c0_1] : memref<8x128xf32, #tpu.memory_space<vmem>>, vector<8x128xf32>
    %c0_2 = arith.constant 0 : index
    %c0_3 = arith.constant 0 : index
    %4 = vector.load %arg3[%c0_2, %c0_3] : memref<8x128xf32, #tpu.memory_space<vmem>>, vector<8x128xf32>
    %5 = math.absf %3 : vector<8x128xf32>
    %cst = arith.constant 0.000000e+00 : f32
    %6 = vector.broadcast %cst : f32 to vector<8x128xf32>
    %7 = arith.subf %6, %5 : vector<8x128xf32>
    %8 = math.exp %7 : vector<8x128xf32>
    %cst_4 = arith.constant 1.000000e+00 : f32
    %9 = vector.broadcast %cst_4 : f32 to vector<8x128xf32>
    %10 = arith.addf %9, %8 : vector<8x128xf32>
    %cst_5 = arith.constant 0.000000e+00 : f32
    %11 = vector.broadcast %cst_5 : f32 to vector<8x128xf32>
    %12 = arith.cmpf oge, %3, %11 : vector<8x128xf32>
    %cst_6 = arith.constant 1.000000e+00 : f32
    %13 = vector.broadcast %cst_6 : f32 to vector<8x128xf32>
    %14 = arith.select %12, %13, %8 : vector<8x128xi1>, vector<8x128xf32>
    %15 = arith.divf %14, %10 : vector<8x128xf32>
    %cst_7 = arith.constant 0.000000e+00 : f32
    %16 = vector.broadcast %cst_7 : f32 to vector<8x128xf32>
    %17 = arith.maximumf %3, %16 : vector<8x128xf32>
    %18 = arith.mulf %3, %4 : vector<8x128xf32>
    %19 = arith.subf %17, %18 : vector<8x128xf32>
    %20 = math.log1p %8 : vector<8x128xf32>
    %21 = arith.addf %19, %20 : vector<8x128xf32>
    %c0_8 = arith.constant 0 : index
    %c0_9 = arith.constant 0 : index
    %22 = vector.load %arg7[%c0_8, %c0_9] : memref<8x128xf32, #tpu.memory_space<vmem>>, vector<8x128xf32>
    %23 = arith.mulf %15, %4 : vector<8x128xf32>
    %24 = arith.addf %22, %23 : vector<8x128xf32>
    %c0_10 = arith.constant 0 : index
    %c0_11 = arith.constant 0 : index
    %25 = vector.load %arg7[%c0_10, %c0_11] : memref<8x128xf32, #tpu.memory_space<vmem>>, vector<8x128xf32>
    tpu.vector_store %arg7[%c0_10, %c0_11], %24 {strides = array<i32>} : memref<8x128xf32, #tpu.memory_space<vmem>>, vector<8x128xf32>,
    %c0_12 = arith.constant 0 : index
    %c0_13 = arith.constant 0 : index
    %26 = vector.load %arg8[%c0_12, %c0_13] : memref<8x128xf32, #tpu.memory_space<vmem>>, vector<8x128xf32>
    %27 = arith.addf %15, %4 : vector<8x128xf32>
    %28 = arith.addf %26, %27 : vector<8x128xf32>
    %c0_14 = arith.constant 0 : index
    %c0_15 = arith.constant 0 : index
    %29 = vector.load %arg8[%c0_14, %c0_15] : memref<8x128xf32, #tpu.memory_space<vmem>>, vector<8x128xf32>
    tpu.vector_store %arg8[%c0_14, %c0_15], %28 {strides = array<i32>} : memref<8x128xf32, #tpu.memory_space<vmem>>, vector<8x128xf32>,
    %c0_16 = arith.constant 0 : index
    %c0_17 = arith.constant 0 : index
    %30 = vector.load %arg9[%c0_16, %c0_17] : memref<8x128xf32, #tpu.memory_space<vmem>>, vector<8x128xf32>
    %31 = arith.addf %30, %21 : vector<8x128xf32>
    %c0_18 = arith.constant 0 : index
    %c0_19 = arith.constant 0 : index
    %32 = vector.load %arg9[%c0_18, %c0_19] : memref<8x128xf32, #tpu.memory_space<vmem>>, vector<8x128xf32>
    tpu.vector_store %arg9[%c0_18, %c0_19], %31 {strides = array<i32>} : memref<8x128xf32, #tpu.memory_space<vmem>>, vector<8x128xf32>,
    %c0_i32_20 = arith.constant 0 : i32
    %33 = arith.cmpi eq, %arg1, %c0_i32_20 : i32
    %34 = arith.extui %33 : i1 to i32
    %c0_i32_21 = arith.constant 0 : i32
    %35 = arith.cmpi ne, %34, %c0_i32_21 : i32
    scf.if %35 {
      %c0_22 = arith.constant 0 : index
      %c0_23 = arith.constant 0 : index
      %36 = vector.load %arg7[%c0_22, %c0_23] : memref<8x128xf32, #tpu.memory_space<vmem>>, vector<8x128xf32>
      %37 = vector.shape_cast %36 : vector<8x128xf32> to vector<1x1x8x128xf32>
      %cst_24 = arith.constant dense<0.000000e+00> : vector<1x8x128xf32>
      %38 = vector.multi_reduction <add>, %37, %cst_24 [1] : vector<1x1x8x128xf32> to vector<1x8x128xf32>
      %c0_25 = arith.constant 0 : index
      %c0_26 = arith.constant 0 : index
      %c0_27 = arith.constant 0 : index
      %39 = vector.load %arg4[%c0_25, %c0_26, %c0_27] : memref<1x8x128xf32, #tpu.memory_space<vmem>>, vector<1x8x128xf32>
      tpu.vector_store %arg4[%c0_25, %c0_26, %c0_27], %38 {strides = array<i32>} : memref<1x8x128xf32, #tpu.memory_space<vmem>>, vector<1x8x128xf32>,
      %c0_28 = arith.constant 0 : index
      %c0_29 = arith.constant 0 : index
      %40 = vector.load %arg8[%c0_28, %c0_29] : memref<8x128xf32, #tpu.memory_space<vmem>>, vector<8x128xf32>
      %41 = vector.shape_cast %40 : vector<8x128xf32> to vector<1x1x8x128xf32>
      %cst_30 = arith.constant dense<0.000000e+00> : vector<1x8x128xf32>
      %42 = vector.multi_reduction <add>, %41, %cst_30 [1] : vector<1x1x8x128xf32> to vector<1x8x128xf32>
      %c0_31 = arith.constant 0 : index
      %c0_32 = arith.constant 0 : index
      %c0_33 = arith.constant 0 : index
      %43 = vector.load %arg5[%c0_31, %c0_32, %c0_33] : memref<1x8x128xf32, #tpu.memory_space<vmem>>, vector<1x8x128xf32>
      tpu.vector_store %arg5[%c0_31, %c0_32, %c0_33], %42 {strides = array<i32>} : memref<1x8x128xf32, #tpu.memory_space<vmem>>, vector<1x8x128xf32>,
      %c0_34 = arith.constant 0 : index
      %c0_35 = arith.constant 0 : index
      %44 = vector.load %arg9[%c0_34, %c0_35] : memref<8x128xf32, #tpu.memory_space<vmem>>, vector<8x128xf32>
      %45 = vector.shape_cast %44 : vector<8x128xf32> to vector<1x1x8x128xf32>
      %cst_36 = arith.constant dense<0.000000e+00> : vector<1x8x128xf32>
      %46 = vector.multi_reduction <add>, %45, %cst_36 [1] : vector<1x1x8x128xf32> to vector<1x8x128xf32>
      %c0_37 = arith.constant 0 : index
      %c0_38 = arith.constant 0 : index
      %c0_39 = arith.constant 0 : index
      %47 = vector.load %arg6[%c0_37, %c0_38, %c0_39] : memref<1x8x128xf32, #tpu.memory_space<vmem>>, vector<1x8x128xf32>
      tpu.vector_store %arg6[%c0_37, %c0_38, %c0_39], %46 {strides = array<i32>} : memref<1x8x128xf32, #tpu.memory_space<vmem>>, vector<1x8x128xf32>,
    } else {
    }
    return
  }
  func.func @transform_0(%arg0: i32, %arg1: i32) -> (i32, i32) {
    %c1_i32 = arith.constant 1 : i32
    %0 = arith.muli %arg0, %c1_i32 : i32
    %1 = arith.addi %0, %arg1 : i32
    %c0_i32 = arith.constant 0 : i32
    %c0_i32_0 = arith.constant 0 : i32
    return %1, %c0_i32 : i32, i32
  }
  func.func @transform_1(%arg0: i32, %arg1: i32) -> (i32, i32) {
    %c1_i32 = arith.constant 1 : i32
    %0 = arith.muli %arg0, %c1_i32 : i32
    %1 = arith.addi %0, %arg1 : i32
    %c0_i32 = arith.constant 0 : i32
    %c0_i32_0 = arith.constant 0 : i32
    return %1, %c0_i32 : i32, i32
  }
  func.func @transform_2(%arg0: i32, %arg1: i32) -> (i32, i32, i32) {
    %c0_i32 = arith.constant 0 : i32
    %c0_i32_0 = arith.constant 0 : i32
    %c0_i32_1 = arith.constant 0 : i32
    return %arg0, %c0_i32, %c0_i32_0 : i32, i32, i32
  }
  func.func @transform_3(%arg0: i32, %arg1: i32) -> (i32, i32, i32) {
    %c0_i32 = arith.constant 0 : i32
    %c0_i32_0 = arith.constant 0 : i32
    %c0_i32_1 = arith.constant 0 : i32
    return %arg0, %c0_i32, %c0_i32_0 : i32, i32, i32
  }
  func.func @transform_4(%arg0: i32, %arg1: i32) -> (i32, i32, i32) {
    %c0_i32 = arith.constant 0 : i32
    %c0_i32_0 = arith.constant 0 : i32
    %c0_i32_1 = arith.constant 0 : i32
    return %arg0, %c0_i32, %c0_i32_0 : i32, i32, i32
  }
}

</mosaic_0001>

<bundles_post_ra>
// kernel: tpu_custom_call.1
= control target key start
LH: loop header
LB: loop body
LE: loop exit
PB: predicated region body
PF: predicated region fallthrough
CT: control target
= control target key end

     0   :  { %s1199_s0 = inlined_call_operand.hbm [shape: f32[16,128], index: 0, kind: input, shape index: {}]   ;;  %s1200_s1 = inlined_call_operand.hbm [shape: f32[16,128], index: 1, kind: input, shape index: {}]   ;;  %s1201_s2 = inlined_call_operand.hbm [shape: f32[2,8,128], index: 2, kind: output, shape index: {0}]   ;;  %s1202_s3 = inlined_call_operand.hbm [shape: f32[2,8,128], index: 3, kind: output, shape index: {1}]   ;;  %s1203_s4 = inlined_call_operand.hbm [shape: f32[2,8,128], index: 4, kind: output, shape index: {2}]  }
   0x1   :  { %1208 = sst [smem:[#allocation18_spill]] %s1199_s0 }
   0x2   :  { %10 = vsyncpa [#allocation6], 0 }
   0x3   :  { %12 = vsyncpa [#allocation6 + $0x1], 0 }
   0x4   :  { %13 = vsyncpa [#allocation9], 0 }
   0x5   :  { %15 = vsyncpa [#allocation9 + $0x1], 0 }
   0x6   :  { %16 = vsyncpa [#allocation7], 0 }
   0x7   :  { %18 = vsyncpa [#allocation7 + $0x1], 0 }
   0x8   :  { %19 = vsyncpa [#allocation12], 0 }
   0x9   :  { %21 = vsyncpa [#allocation12 + $0x1], 0  ;;  %s899_s15 = smov 0   ;;  %s901_s16 = smov 0  }
   0xa   :  { %s903_s17 = smov 0   ;;  %s905_s18 = smov 0  }
   0xb   :  { %s907_s19 = smov 0   ;;  %s909_s20 = smov 0  }
   0xc LB: > { %s930_s21 = sadd.s32 4294967295, %s867_s20   ;;  %s1204_s22 = sadd.s32 4294967294, %s867_s20   ;;  %s867_s20 = sphi %s909_s20, %s27_s20   ;;  %s863_s19 = sphi %s907_s19, %s1229_s19   ;;  %s859_s18 = sphi %s905_s18, %s1228_s18   ;;  %s855_s17 = sphi %s903_s17, %s1227_s17   ;;  %s851_s16 = sphi %s901_s16, %s1226_s16   ;;  %s847_s15 = sphi %s899_s15, %s1225_s15  }
   0xd   : > { %s39_s23 = sadd.s32 1, %s863_s19  ;;  %s48_s24 = sadd.s32 1, %s855_s17 }
   0xe   : > { %p41_p0 = scmp.ge.s32.totalorder %s39_s23, 2  ;;  %p55_p1 = scmp.ne.s32.totalorder %s855_s17, %s851_s16 }
   0xf   : > { %p56_p2 = scmp.eq.s32.totalorder %s867_s20, 0  ;;  %p61_p3 = scmp.ne.s32.totalorder %s851_s16, %s847_s15 }
  0x10   : > { %s1231_s23 = smov (%p41_p0, %s39_s23), 0  ;;  %p62_p5 = scmp.eq.s32.totalorder %s930_s21, 0 }
  0x11   : > { %p942_p4 = por %p56_p2, %p55_p1  ;;  %s45_s26 = ssub.s32 %s863_s19, %s1231_s23 }
  0x12   : > { %p113_p6 = scmp.eq.s32.totalorder %s930_s21, 1  ;;  %p46_p7 = scmp.eq.s32.totalorder %s45_s26, 0 }
  0x13   : > { %p950_p8 = por %p62_p5, %p61_p3  ;;  %p119_p10 = scmp.eq.s32.totalorder %s1204_s22, 1 }
  0x14   : > { %p954_p9 = por %p113_p6, %p55_p1  ;;  %p605_p13 = scmp.lt.s32.totalorder %s867_s20, 2 }
  0x15   : > { %s1210_s27 = scalar_select %p950_p8, 1, 0 }
  0x16   : > { %s1211_s28 = scalar_select %p954_p9, 1, 0 }
  0x17   : > { %s961_s29 = scalar_select %p46_p7, %s855_s17, %s48_s24  }
  0x18   : > { %p963_p11 = por %p119_p10, %p61_p3  ;;  %s970_s5 = sand.u32 1, %s855_s17  }
  0x19   : > { %s560_s6 = sshll.u32 %s970_s5, 3  ;;  %s561_s7 = sshll.u32 %s863_s19, 7 }
  0x1a   : > { %s1212_s30 = scalar_select %p963_p11, 1, 0 }
  0x1b   : > { %s1213_s0 = sld [smem:[#allocation18_spill]]  ;;  %s195_s11 = scalar_lea.vmem [#allocation5], %s560_s6 }
  0x1c   : > { %s203_s12 = sshll.u32 %s195_s11, 4  ;;  %p987_p0 = pnand %p605_p13, %p942_p4  ;;  %s983_s12 = int_to_ptr.vmem [resolvable:$true] %s203_s12 }
  0x1d   : > { %s192_s14 = scalar_lea.sflag [#allocation6], %s970_s5 }
  0x1e   : > { %p663_p5 = pneg %p987_p0 }
  0x21   : > { %s979_s10 = scalar_lea.hbm %s1213_s0, %s561_s7  ;;  %s666_s25 = scalar_lea.hbm %s1213_s0, 256 }
  0x22   : > { %s661_s24 = scalar_lea.hbm %s979_s10, 128  ;;  %p667_p4 = scmp.lt.u32.totalorder %s979_s10, %s1213_s0 }
  0x23   : > { %p662_p3 = scmp.ne.s32.totalorder %s979_s10, %s661_s24  ;;  %p668_p10 = scmp.lt.u32.totalorder %s666_s25, %s661_s24 }
  0x24   : > { %p670_p12 = scmp.lt.u32.totalorder %s661_s24, %s979_s10 }
  0x25   : > { %p664_p6 = pnand %p663_p5, %p662_p3  ;;  %p669_p13 = por %p668_p10, %p667_p4 }
  0x27   : > { %p665_p7 = pneg %p664_p6  ;;  %p671_p1 = por %p670_p12, %p669_p13 }
  0x29   : > { %p672_p2 = pnand %p671_p1, %p665_p7 }
  0x2b   : > { %675 = shalt.err (!%p672_p2)
}
  0x2c   : > { %s676_s22 = scalar_lea.vmem %s983_s12, 128  ;;  %s869_s26 = smov [#allocation5]  }
  0x2d   : > { %p677_p3 = scmp.ne.s32.totalorder %s983_s12, %s676_s22  ;;  %s681_s8 = sshll.u32 %s869_s26, 4  ;;  %s682_s8 = int_to_ptr.vmem [resolvable:$false] %s681_s8 }
  0x2e   : > { %s683_s9 = scalar_lea.vmem %s682_s8, 256  ;;  %p684_p9 = scmp.lt.s32.totalorder %s983_s12, %s682_s8 }
  0x2f   : > { %p679_p6 = pnand %p677_p3, %p663_p5  ;;  %p685_p4 = scmp.lt.s32.totalorder %s683_s9, %s676_s22 }
  0x31   : > { %p680_p11 = pneg %p679_p6  ;;  %p686_p10 = por %p685_p4, %p684_p9 }
  0x33   : > { %p687_p12 = pnand %p686_p10, %p680_p11 }
  0x35   : > { %690 = shalt.err (!%p687_p12)
}
  0x36   : > { %591 = dma.hbm_to_vmem [thread:$0]  (!%p987_p0), %s979_s10, 128, %s983_s12, %s192_s14  }
  0x37   : > { %p1215_p1 = scmp.lt.s32.totalorder %s867_s20, 3  ;;  %p1216_p2 = scmp.ge.s32.totalorder %s867_s20, 1 }
  0x38   : > { %s1032_s11 = scalar_lea.hbm %s1200_s1, %s561_s7  ;;  %s214_s26 = scalar_lea.vmem [#allocation8], %s560_s6 }
  0x39   : > { %p1023_p7 = pnand %p1216_p2, %p1215_p1  ;;  %s222_s8 = sshll.u32 %s214_s26, 4  ;;  %s223_s8 = int_to_ptr.vmem [resolvable:$true] %s222_s8 }
  0x3a   : > { %s211_s10 = scalar_lea.sflag [#allocation9], %s970_s5  ;;  %s691_s12 = scalar_lea.hbm %s1032_s11, 128 }
  0x3b   : > { %s1217_s24 = scalar_select %p1023_p7, 1, 0 }
  0x3c   : > { %p692_p9 = scmp.ne.s32.totalorder %s1032_s11, %s691_s12  ;;  %s696_s7 = scalar_lea.hbm %s1200_s1, 256 }
  0x3d   : > { %p697_p3 = scmp.lt.u32.totalorder %s1032_s11, %s1200_s1  ;;  %p698_p6 = scmp.lt.u32.totalorder %s696_s7, %s691_s12 }
  0x3e   : > { %p694_p11 = pnand %p692_p9, %p663_p5  ;;  %p700_p10 = scmp.lt.u32.totalorder %s691_s12, %s1032_s11 }
  0x3f   : > { %p699_p4 = por %p698_p6, %p697_p3 }
  0x40   : > { %p695_p13 = pneg %p694_p11 }
  0x41   : > { %p701_p12 = por %p700_p10, %p699_p4 }
  0x43   : > { %p702_p1 = pnand %p701_p12, %p695_p13 }
  0x45   : > { %705 = shalt.err (!%p702_p1)
}
  0x46   : > { %s706_s5 = scalar_lea.vmem %s223_s8, 128  ;;  %s870_s6 = smov [#allocation8]  }
  0x47   : > { %p707_p2 = scmp.ne.s32.totalorder %s223_s8, %s706_s5  ;;  %s711_s26 = sshll.u32 %s870_s6, 4  ;;  %s712_s26 = int_to_ptr.vmem [resolvable:$false] %s711_s26 }
  0x48   : > { %s713_s14 = scalar_lea.vmem %s712_s26, 256  ;;  %p714_p8 = scmp.lt.s32.totalorder %s223_s8, %s712_s26 }
  0x49   : > { %p709_p9 = pnand %p707_p2, %p663_p5  ;;  %p715_p7 = scmp.lt.s32.totalorder %s713_s14, %s706_s5 }
  0x4b   : > { %p710_p11 = pneg %p709_p9  ;;  %p716_p3 = por %p715_p7, %p714_p8 }
  0x4d   : > { %p717_p6 = pnand %p716_p3, %p710_p11 }
  0x4f   : > { %720 = shalt.err (!%p717_p6)
}
  0x50   : > { %594 = dma.hbm_to_vmem [thread:$0]  (!%p987_p0), %s1032_s11, 128, %s223_s8, %s211_s10  }
  0x51   : > { %p1218_p13 = scmp.ne.s32.totalorder %s1217_s24, 0 }
  0x52   : > { %s1059_s12 = sand.u32 (!%p1218_p13), 1, %s851_s16   ;;  %p1219_p8 = scmp.ne.s32.totalorder (!%p1218_p13), %s1210_s27, 0 }
  0x53   : > { %231 = sbr.rel (%p1218_p13) target bundleno = 193 (0xc1), region = 28  ;;  %s1062_s9 = sshll.u32 (!%p1218_p13), %s1059_s12, 3 }
  0x54   : > { %s234_s7 = scalar_lea.sflag (!%p1218_p13), [#allocation6], %s1059_s12  ;;  %s237_s22 = scalar_lea.vmem (!%p1218_p13), [#allocation5], %s1062_s9 }
  0x5a   : > { %830 = dma.done.wait (%p1219_p8), %s234_s7, 128  }
  0x5b   : > { %832 = vsyncadd (%p1219_p8), %s234_s7, 4294967168  ;;  %s243_s13 = scalar_lea.sflag [#allocation9], %s1059_s12  ;;  %s246_s24 = scalar_lea.vmem [#allocation8], %s1062_s9 }
  0x5c   : > { %834 = dma.done.wait (%p1219_p8), %s243_s13, 128  }
  0x5d   : > { %836 = vsyncadd (%p1219_p8), %s243_s13, 4294967168  ;;  %v295_v0 = vld [vmem:[%s237_s22] sm:$0xff]  ;;  %v296_v7 = vld [vmem:[%s246_s24] sm:$0xff]  ;;  %s278_s27 = scalar_lea.vmem [#allocation11], %s1062_s9  ;;  %s271_s8 = scalar_lea.vmem [#allocation10], %s1062_s9 }
  0x5e   : > { %v297_v1 = vand.u32 2147483647, %v295_v0  ;;  %vm302_vm0 = vcmp.ge.f32.partialorder %v295_v0, 0.0  ;;  %v306_v9 = vmax.f32 %v295_v0, 0.0  ;;  %v307_v10 = vmul.f32 %v296_v7, %v295_v0  ;;  %s379_s11 = sshll.u32 %s278_s27, 4  ;;  %s366_s10 = sshll.u32 %s271_s8, 4  ;;  %s1080_s11 = int_to_ptr.vmem [resolvable:$true] %s379_s11  ;;  %s1082_s10 = int_to_ptr.vmem [resolvable:$true] %s366_s10 }
  0x5f   : > { %s347_s25 = sand.u32 1, %s930_s21   ;;  %s573_s5 = sshll.u32 %s859_s18, 7 }
  0x60   : > { %v298_v2 = vsub.f32 0.0, %v297_v1  ;;  %v308_v17 = vsub.f32 %v306_v9, %v307_v10  ;;  %s1207_s6 = scalar_lea.vmem [#allocation13], %s1062_s9  ;;  %s1090_s18 = scalar_lea.hbm %s1202_s3, %s573_s5 }
  0x61   : > { %s392_s26 = sshll.u32 %s1207_s6, 4  ;;  %s1095_s13 = scalar_lea.hbm %s1201_s2, %s573_s5  ;;  %s1097_s26 = int_to_ptr.vmem [resolvable:$true] %s392_s26 }
  0x62   : > { %v299_v3 = vmul.f32 1.442695, %v298_v2  ;;  %s1102_s0 = scalar_lea.hbm %s1203_s4, %s573_s5  ;;  %s1104_s14 = scalar_lea.sflag [#allocation12], %s347_s25 }
  0x63   : > { %s721_s21 = scalar_lea.vmem %s1080_s11, 128  ;;  %p1220_p5 = scmp.ne.s32.totalorder %s1211_s28, 0 }
  0x64   : > { %655 = vpow2.f32 %v299_v3  ;;  %p722_p0 = scmp.ne.s32.totalorder %s1080_s11, %s721_s21  ;;  %s871_s7 = smov [#allocation11]  }
  0x65   : > { %s725_s22 = sshll.u32 %s871_s7, 4  ;;  %s726_s22 = int_to_ptr.vmem [resolvable:$false] %s725_s22 }
  0x66   : > { %p723_p7 = pnand %p722_p0, %p1220_p5  ;;  %p728_p10 = scmp.lt.s32.totalorder %s1080_s11, %s726_s22 }
  0x68   : > { %p724_p4 = pneg %p723_p7 }
  0x6e   : > { %v656_v4 = vpop.eup %655 }
  0x6f   : > { %v301_v5 = vadd.f32 1.0, %v656_v4  ;;  %v312_v6 = vmul.f32 -0.5, %v656_v4  ;;  %v315_v11 = vand.u32 2147483647, %v656_v4  ;;  %v303_v12 = vsel %vm302_vm0, 1.0, %v656_v4 }
  0x71   : > { %657 = vrcp.f32 %v301_v5  ;;  %v313_v8 = vadd.f32 1.0, %v312_v6  ;;  %vm316_vm1 = vcmp.lt.f32.partialorder %v315_v11, 0.0004427343 }
  0x72   : > { %659 = vlog2.f32 %v301_v5 }
  0x73   : > { %v314_v14 = vmul.f32 %v656_v4, %v313_v8 }
  0x7b   : > { %v658_v13 = vpop.eup %657 }
  0x7c   : > { %v660_v15 = vpop.eup %659  ;;  %v305_v16 = vmul.f32 %v658_v13, %v303_v12 }
  0x7d   : > { %v311_v18 = vmul.f32 0.6931472, %v660_v15 }
  0x7e   : > { %v324_v19 = vadd.f32 %v305_v16, %v296_v7  ;;  %v320_v20 = vmul.f32 %v305_v16, %v296_v7 }
  0x7f   : > { %v317_v21 = vsel %vm316_vm1, %v314_v14, %v311_v18 }
  0x80   : > { %338 = vst [vmem:[%s278_s27] sm:$0xff] %v324_v19  ;;  %335 = vst [vmem:[%s271_s8] sm:$0xff] %v320_v20  ;;  %v318_v22 = vadd.f32 %v317_v21, %v308_v17  ;;  %s727_s27 = scalar_lea.vmem %s726_s22, 256 }
  0x81   : > { %p729_p12 = scmp.lt.s32.totalorder %s727_s27, %s721_s21 }
  0x83   : > { %p730_p1 = por %p729_p12, %p728_p10 }
  0x85   : > { %p731_p2 = pnand %p730_p1, %p724_p4 }
  0x87   : > { %734 = shalt.err (!%p731_p2)
}
  0x88   : > { %s735_s8 = scalar_lea.hbm %s1090_s18, 128  ;;  %s739_s6 = scalar_lea.hbm %s1202_s3, 256 }
  0x89   : > { %p736_p9 = scmp.ne.s32.totalorder %s1090_s18, %s735_s8  ;;  %p740_p6 = scmp.lt.u32.totalorder %s1090_s18, %s1202_s3 }
  0x8a   : > { %p741_p13 = scmp.lt.u32.totalorder %s739_s6, %s735_s8  ;;  %p743_p0 = scmp.lt.u32.totalorder %s735_s8, %s1090_s18 }
  0x8b   : > { %p737_p11 = pnand %p736_p9, %p1220_p5 }
  0x8c   : > { %p742_p8 = por %p741_p13, %p740_p6 }
  0x8d   : > { %p738_p3 = pneg %p737_p11 }
  0x8e   : > { %p744_p7 = por %p743_p0, %p742_p8 }
  0x90   : > { %p745_p4 = pnand %p744_p7, %p738_p3 }
  0x92   : > { %748 = shalt.err (!%p745_p4)
}
  0x93   : > { %583 = dma.vmem_to_hbm [thread:$0]  (%p1220_p5), %s1080_s11, 128, %s1090_s18, %s1104_s14  }
  0x94   : > { %s1221_s21 = scalar_lea.vmem [#allocation13], %s1062_s9  ;;  %s343_s22 = scalar_lea.sflag [#allocation7], %s1059_s12 }
  0x95   : > { %341 = vst [vmem:[%s1221_s21] sm:$0xff] %v318_v22  ;;  %s749_s27 = scalar_lea.vmem %s1082_s10, 128  ;;  %s872_s8 = smov [#allocation10]  }
  0x96   : > { %p750_p10 = scmp.ne.s32.totalorder %s1082_s10, %s749_s27  ;;  %s753_s25 = sshll.u32 %s872_s8, 4  ;;  %s754_s25 = int_to_ptr.vmem [resolvable:$false] %s753_s25 }
  0x97   : > { %s755_s5 = scalar_lea.vmem %s754_s25, 256  ;;  %p756_p2 = scmp.lt.s32.totalorder %s1082_s10, %s754_s25 }
  0x98   : > { %p751_p12 = pnand %p750_p10, %p1220_p5  ;;  %p757_p9 = scmp.lt.s32.totalorder %s755_s5, %s749_s27 }
  0x9a   : > { %p752_p1 = pneg %p751_p12  ;;  %p758_p11 = por %p757_p9, %p756_p2 }
  0x9c   : > { %p759_p3 = pnand %p758_p11, %p752_p1 }
  0x9e   : > { %762 = shalt.err (!%p759_p3)
}
  0x9f   : > { %s763_s12 = scalar_lea.hbm %s1095_s13, 128  ;;  %s767_s18 = scalar_lea.hbm %s1201_s2, 256 }
  0xa0   : > { %p764_p6 = scmp.ne.s32.totalorder %s1095_s13, %s763_s12  ;;  %p768_p0 = scmp.lt.u32.totalorder %s1095_s13, %s1201_s2 }
  0xa1   : > { %p769_p7 = scmp.lt.u32.totalorder %s767_s18, %s763_s12  ;;  %p771_p10 = scmp.lt.u32.totalorder %s763_s12, %s1095_s13 }
  0xa2   : > { %p765_p13 = pnand %p764_p6, %p1220_p5 }
  0xa3   : > { %p770_p4 = por %p769_p7, %p768_p0 }
  0xa4   : > { %p766_p8 = pneg %p765_p13 }
  0xa5   : > { %p772_p12 = por %p771_p10, %p770_p4 }
  0xa7   : > { %p773_p1 = pnand %p772_p12, %p766_p8 }
  0xa9   : > { %776 = shalt.err (!%p773_p1)
}
  0xaa   : > { %582 = dma.vmem_to_hbm [thread:$0]  (%p1220_p5), %s1082_s10, 128, %s1095_s13, %s343_s22  }
  0xab   : > { %s777_s7 = scalar_lea.vmem %s1097_s26, 128  ;;  %s873_s21 = smov [#allocation13]  }
  0xac   : > { %p778_p2 = scmp.ne.s32.totalorder %s1097_s26, %s777_s7  ;;  %s781_s27 = sshll.u32 %s873_s21, 4  ;;  %s782_s27 = int_to_ptr.vmem [resolvable:$false] %s781_s27 }
  0xad   : > { %s783_s8 = scalar_lea.vmem %s782_s27, 256  ;;  %p784_p3 = scmp.lt.s32.totalorder %s1097_s26, %s782_s27 }
  0xae   : > { %p779_p9 = pnand %p778_p2, %p1220_p5  ;;  %p785_p6 = scmp.lt.s32.totalorder %s783_s8, %s777_s7 }
  0xb0   : > { %p780_p11 = pneg %p779_p9  ;;  %p786_p13 = por %p785_p6, %p784_p3 }
  0xb2   : > { %p787_p8 = pnand %p786_p13, %p780_p11 }
  0xb4   : > { %790 = shalt.err (!%p787_p8)
}
  0xb5   : > { %s791_s10 = scalar_lea.hbm %s1102_s0, 128  ;;  %s795_s25 = scalar_lea.hbm %s1203_s4, 256 }
  0xb6   : > { %p792_p0 = scmp.ne.s32.totalorder %s1102_s0, %s791_s10  ;;  %p796_p10 = scmp.lt.u32.totalorder %s1102_s0, %s1203_s4 }
  0xb7   : > { %p797_p12 = scmp.lt.u32.totalorder %s795_s25, %s791_s10  ;;  %p799_p2 = scmp.lt.u32.totalorder %s791_s10, %s1102_s0 }
  0xb8   : > { %p793_p7 = pnand %p792_p0, %p1220_p5 }
  0xb9   : > { %p798_p1 = por %p797_p12, %p796_p10 }
  0xba   : > { %p794_p4 = pneg %p793_p7 }
  0xbb   : > { %p800_p9 = por %p799_p2, %p798_p1 }
  0xbd   : > { %p801_p11 = pnand %p800_p9, %p794_p4 }
  0xbf   : > { %804 = shalt.err (!%p801_p11)
}
  0xc0   : > { %584 = dma.vmem_to_hbm [thread:$0]  (%p1220_p5), %s1097_s26, 128, %s1102_s0, %s1104_s14  }
  0xc1 PF: > { %s404_s9 = sand.u32 1, %s847_s15   ;;  %p1222_p3 = scmp.ne.s32.totalorder %s1212_s30, 0 }
  0xc2   : > { %p1223_p6 = scmp.ge.s32.totalorder %s867_s20, 2  ;;  %s405_s11 = scalar_lea.sflag [#allocation7], %s404_s9 }
  0xc4   : > { %p596_p13 = pnand %p1223_p6, %p1222_p3 }
  0xc6   : > { %838 = dma.done.wait (!%p596_p13), %s405_s11, 128  }
  0xc7   : > { %840 = vsyncadd (!%p596_p13), %s405_s11, 4294967168  ;;  %s1224_s18 = sadd.s32 4294967294, %s867_s20  }
  0xc8   : > { %s413_s6 = sand.u32 1, %s1224_s18  }
  0xc9   : > { %s414_s24 = scalar_lea.sflag [#allocation12], %s413_s6 }
  0xca   : > { %842 = dma.done.wait (!%p596_p13), %s414_s24, 256  }
  0xcb   : > { %844 = vsyncadd (!%p596_p13), %s414_s24, 4294967040  ;;  %s27_s20 = sadd.s32 1, %s867_s20   ;;  %s1225_s15 = smov %s851_s16 }
  0xcc   : > { %p24_p5 = scmp.ge.s32.totalorder %s27_s20, 4   ;;  %s1226_s16 = smov %s855_s17 }
  0xcd   : > { %s1227_s17 = smov %s961_s29  ;;  %s1228_s18 = smov %s863_s19 }
  0xce   : > { %s1229_s19 = smov %s1231_s23  ;;  %26 = sbr.rel (!%p24_p5) target bundleno = 12 (0xc), region = 126 }
  0xd5   :  { %428 = vsyncpa [#allocation6], 1 }
  0xd6   :  { %430 = vsyncpa [#allocation6 + $0x1], 1 }
  0xd7   :  { %431 = vsyncpa [#allocation9], 1 }
  0xd8   :  { %433 = vsyncpa [#allocation9 + $0x1], 1 }
  0xd9   :  { %434 = vsyncpa [#allocation7], 1 }
  0xda   :  { %436 = vsyncpa [#allocation7 + $0x1], 1 }
  0xdb   :  { %437 = vsyncpa [#allocation12], 1 }
  0xdc   :  { %439 = vsyncpa [#allocation12 + $0x1], 1 }

</bundles_post_ra>
